<compile_context>
chip_gen: v5e
topology: v5e:2x2
jax: 0.10.0
libtpu: 0.0.40
codegen_flags: <defaults>
</compile_context>

<pallas_src>
import jax
import jax.numpy as jnp
from jax.experimental import pallas as pl
from jax.experimental.pallas import tpu as pltpu

_LANES = 128
_SUBLANES = 8
_FAST_PATH_BYTES = 2 << 20      # gridless full-array path only below this
_POLICY_TILE_BYTES = 2 << 20    # ~2 MiB per policy tile saturates HBM BW
_MAX_TILE_ROWS = 4096


def _round_up(x, m):
    return ((x + m - 1) // m) * m


def _as_policy_dtype(x):
    """bf16 policy tensors are the documented fast path (halves HBM reads of
    the two (B, A) arrays that dominate runtime); everything else -> f32."""
    x = jnp.asarray(x)
    if x.dtype in (jnp.bfloat16, jnp.float32):
        return x
    return x.astype(jnp.float32)


def _make_alpha_loss_kernel(block_rows, true_b, mask_tail):
    """Per-block partial sum: sum((v - z)^2) - sum(pi * logp).

    log_ps_ref / target_ps_ref : (block_rows, A)  f32 or bf16 (cast to f32)
    vs_ref / target_vs_ref     : (1, block_rows)  f32, lane-dense
    out_ref                    : (1, 1)           f32 in SMEM
    If mask_tail, rows/lanes with global index >= true_b contribute 0
    (the last partial block's out-of-range contents are NOT assumed zero).
    Normalization by the true batch size happens in the wrapper.
    """

    def kernel(log_ps_ref, target_ps_ref, vs_ref, target_vs_ref, out_ref):
        lp = log_ps_ref[...].astype(jnp.float32)
        tp = target_ps_ref[...].astype(jnp.float32)
        v = vs_ref[...].astype(jnp.float32)
        z = target_vs_ref[...].astype(jnp.float32)

        prod = tp * lp                      # VPU
        dv = v - z
        if mask_tail:
            start = pl.program_id(0) * block_rows
            row_ids = start + jax.lax.broadcasted_iota(jnp.int32, prod.shape, 0)
            prod = jnp.where(row_ids < true_b, prod, 0.0)
            lane_ids = start + jax.lax.broadcasted_iota(jnp.int32, dv.shape, 1)
            dv = jnp.where(lane_ids < true_b, dv, 0.0)

        # Single full reduce per term (XLU); kernel is DMA-bound anyway.
        out_ref[0, 0] = jnp.sum(dv * dv) - jnp.sum(prod)

    return kernel


def _policy_block_spec(tb, A, buffered):
    index_map = lambda i: (i, 0)
    if buffered:
        try:
            return pl.BlockSpec((tb, A), index_map, pipeline_mode=pl.Buffered(3))
        except (AttributeError, TypeError):
            pass
    return pl.BlockSpec((tb, A), index_map)


def alpha_loss(log_ps, vs, target_ps, target_vs, *, block_rows=None,
               core_parallel=True):
    """Pallas TPU implementation of AlphaLoss.forward.

    Args:
      log_ps:     (B, A) float32 or bfloat16 log-probabilities (bf16 is the
                  fast path: the kernel is HBM-read bound).
      vs:         (B,) or (B, 1) predicted values.
      target_ps:  (B, A) float32 or bfloat16 target probabilities.
      target_vs:  (B,) or (B, 1) target values.
      block_rows: optional batch-tile override (rounded to a multiple of 128).
      core_parallel: try CORE_PARALLEL on the batch axis (v7x: both
                  TensorCores share the work); falls back to "parallel".
    Returns:
      scalar float32 loss.
    """
    log_ps = _as_policy_dtype(log_ps)
    target_ps = _as_policy_dtype(target_ps)
    # Lane-dense value layout: B maps to the 128-wide lane axis.
    vs_row = jnp.asarray(vs, jnp.float32).reshape(1, -1)
    target_vs_row = jnp.asarray(target_vs, jnp.float32).reshape(1, -1)

    B, A = log_ps.shape
    itemsize = jnp.dtype(log_ps.dtype).itemsize
    a_lanes = _round_up(A, _LANES)  # VMEM pads the lane axis to 128

    # ---- fast path: tiny input -> single, gridless, full-array block ----
    padded_bytes = (2 * _round_up(B, _SUBLANES) * a_lanes * itemsize
                    + 2 * 4 * _round_up(B, _LANES))
    if block_rows is None and padded_bytes <= _FAST_PATH_BYTES:
        kernel = _make_alpha_loss_kernel(B, B, mask_tail=False)
        partial = pl.pallas_call(
            kernel,
            out_shape=jax.ShapeDtypeStruct((1, 1), jnp.float32),
            in_specs=[
                pl.BlockSpec((B, A), lambda: (0, 0)),
                pl.BlockSpec((B, A), lambda: (0, 0)),
                pl.BlockSpec((1, B), lambda: (0, 0)),
                pl.BlockSpec((1, B), lambda: (0, 0)),
            ],
            out_specs=pl.BlockSpec(memory_space=pltpu.SMEM),
            compiler_params=pltpu.CompilerParams(vmem_limit_bytes=16 << 20),
        )(log_ps, target_ps, vs_row, target_vs_row)
        return partial[0, 0] / B

    # ---- batch tile selection (lane-padded footprint, ~2 MiB per tile) ----
    if block_rows is None:
        tb = _POLICY_TILE_BYTES // max(a_lanes * itemsize, 1)
        tb = min(max(_LANES, (tb // _LANES) * _LANES), _MAX_TILE_ROWS)
    else:
        tb = max(_LANES, (int(block_rows) // _LANES) * _LANES)
    num_blocks = pl.cdiv(B, tb)
    mask_tail = (B % tb) != 0  # no wrapper padding: tail masked in-kernel

    tile_bytes = tb * a_lanes * itemsize
    # 2 policy inputs x up-to-3 buffers + value tiles + slack.
    needed = 2 * 3 * tile_bytes + 4 * 4 * tb + (2 << 20)
    vmem_limit = int(max(16 << 20, min(needed, 64 << 20)))

    kernel = _make_alpha_loss_kernel(tb, B, mask_tail)

    def _run(dim_sem, policy_spec):
        return pl.pallas_call(
            kernel,
            out_shape=jax.ShapeDtypeStruct((num_blocks, 1), jnp.float32),
            grid=(num_blocks,),
            in_specs=[
                policy_spec,                               # log_ps tile
                policy_spec,                               # target_ps tile
                pl.BlockSpec((1, tb), lambda i: (0, i)),   # vs tile (lane-dense)
                pl.BlockSpec((1, tb), lambda i: (0, i)),   # target_vs tile
            ],
            # One scalar partial per grid step -> its own SMEM block; the
            # batch axis carries no state, so it can be sharded across cores.
            out_specs=pl.BlockSpec((1, 1), lambda i: (i, 0),
                                   memory_space=pltpu.SMEM),
            compiler_params=pltpu.CompilerParams(
                dimension_semantics=(dim_sem,),
                vmem_limit_bytes=vmem_limit,
            ),
        )(log_ps, target_ps, vs_row, target_vs_row)

    buffered_spec = _policy_block_spec(tb, A, buffered=True)
    plain_spec = _policy_block_spec(tb, A, buffered=False)

    attempts = []
    core_sem = getattr(pltpu, "CORE_PARALLEL", None)
    if core_parallel and core_sem is not None and num_blocks > 1:
        attempts.append((core_sem, buffered_spec))        # v7x: use both TCs
    attempts.append(("parallel", buffered_spec))
    attempts.append(("parallel", plain_spec))

    partials = None
    for idx, (sem, p_spec) in enumerate(attempts):
        try:
            partials = _run(sem, p_spec)
            break
        except Exception:
            if idx == len(attempts) - 1:
                raise

    # Tiny final reduction + 1/B normalization (true B) in JAX.
    return jnp.sum(partials) / B


def _alpha_loss_ref(log_ps, vs, target_ps, target_vs):
    log_ps = jnp.asarray(log_ps, jnp.float32)
    target_ps = jnp.asarray(target_ps, jnp.float32)
    vs = jnp.asarray(vs, jnp.float32).reshape(-1)
    target_vs = jnp.asarray(target_vs, jnp.float32).reshape(-1)
    value_loss = jnp.mean((vs - target_vs) ** 2)
    policy_loss = -jnp.mean(jnp.sum(target_ps * log_ps, axis=1))
    return value_loss + policy_loss


def _make_inputs(key, B, A):
    k1, k2, k3, k4 = jax.random.split(key, 4)
    log_ps = jax.nn.log_softmax(jax.random.normal(k1, (B, A), jnp.float32), axis=1)
    vs = jnp.tanh(jax.random.normal(k2, (B,), jnp.float32))
    target_vs = jnp.sign(jax.random.normal(k3, (B,), jnp.float32))
    target_ps = jax.nn.softmax(jax.random.normal(k4, (B, A), jnp.float32), axis=1)
    return log_ps, vs, target_ps, target_vs


if __name__ == "__main__":
    key = jax.random.PRNGKey(0)
    ka, kb, kc, kd = jax.random.split(key, 4)

    # ---- Case 1: tiny shapes -> gridless fast path (B=8, A=128) ----
    lp1, v1, tp1, z1 = _make_inputs(ka, 8, 128)
    loss1 = alpha_loss(lp1, v1, tp1, z1)
    jax.block_until_ready(loss1)
    ref1 = _alpha_loss_ref(lp1, v1, tp1, z1)
    assert jnp.allclose(loss1, ref1, rtol=1e-5, atol=1e-5), (loss1, ref1)

    # ---- Case 2: ragged batch, forced tb=128 -> tiled path w/ in-kernel mask ----
    lp2, v2, tp2, z2 = _make_inputs(kb, 300, 96)
    loss2 = alpha_loss(lp2, v2, tp2, z2, block_rows=128)
    jax.block_until_ready(loss2)
    ref2 = _alpha_loss_ref(lp2, v2, tp2, z2)
    assert jnp.allclose(loss2, ref2, rtol=1e-5, atol=1e-5), (loss2, ref2)

    # ---- Case 3: bf16 policy inputs (halved HBM traffic), same tiled path ----
    loss3 = alpha_loss(lp2.astype(jnp.bfloat16), v2,
                       tp2.astype(jnp.bfloat16), z2, block_rows=128)
    jax.block_until_ready(loss3)
    ref3 = _alpha_loss_ref(lp2.astype(jnp.bfloat16), v2,
                           tp2.astype(jnp.bfloat16), z2)
    assert jnp.allclose(loss3, ref3, rtol=1e-4, atol=1e-4), (loss3, ref3)

    # ---- Case 4: divisible batch -> tiled path with no tail mask ----
    lp4, v4, tp4, z4 = _make_inputs(kc, 256, 96)
    loss4 = alpha_loss(lp4, v4, tp4, z4, block_rows=128)
    jax.block_until_ready(loss4)
    ref4 = _alpha_loss_ref(lp4, v4, tp4, z4)
    assert jnp.allclose(loss4, ref4, rtol=1e-5, atol=1e-5), (loss4, ref4)

    # ---- Case 5: default auto tile sizing, ragged batch, odd A ----
    lp5, v5, tp5, z5 = _make_inputs(kd, 4100, 72)
    loss5 = alpha_loss(lp5, v5, tp5, z5)
    jax.block_until_ready(loss5)
    ref5 = _alpha_loss_ref(lp5, v5, tp5, z5)
    assert jnp.allclose(loss5, ref5, rtol=1e-4, atol=1e-4), (loss5, ref5)

    print("KERNEL_OK")
</pallas_src>

<mosaic_0001>
module attributes {stable_mosaic.version = 11 : i64} {
  func.func @kernel(%arg0: memref<8x128xf32, #tpu.memory_space<vmem>>, %arg1: memref<8x128xf32, #tpu.memory_space<vmem>>, %arg2: memref<1x8xf32, #tpu.memory_space<vmem>>, %arg3: memref<1x8xf32, #tpu.memory_space<vmem>>, %arg4: memref<1x1xf32, #tpu.memory_space<smem>>) attributes {dimension_semantics = [], scalar_prefetch = 0 : i64, scratch_operands = 0 : i64, tpu.core_type = #tpu.core_type<tc>} {
    %c0 = arith.constant 0 : index
    %c0_0 = arith.constant 0 : index
    %0 = vector.load %arg0[%c0, %c0_0] : memref<8x128xf32, #tpu.memory_space<vmem>>, vector<8x128xf32>
    %c0_1 = arith.constant 0 : index
    %c0_2 = arith.constant 0 : index
    %1 = vector.load %arg1[%c0_1, %c0_2] : memref<8x128xf32, #tpu.memory_space<vmem>>, vector<8x128xf32>
    %c0_3 = arith.constant 0 : index
    %c0_4 = arith.constant 0 : index
    %2 = vector.load %arg2[%c0_3, %c0_4] : memref<1x8xf32, #tpu.memory_space<vmem>>, vector<1x8xf32>
    %c0_5 = arith.constant 0 : index
    %c0_6 = arith.constant 0 : index
    %3 = vector.load %arg3[%c0_5, %c0_6] : memref<1x8xf32, #tpu.memory_space<vmem>>, vector<1x8xf32>
    %4 = arith.mulf %1, %0 : vector<8x128xf32>
    %5 = arith.subf %2, %3 : vector<1x8xf32>
    %6 = arith.mulf %5, %5 : vector<1x8xf32>
    %7 = vector.shape_cast %6 : vector<1x8xf32> to vector<1x1x8xf32>
    %cst = arith.constant dense<0.000000e+00> : vector<1xf32>
    %8 = vector.multi_reduction <add>, %7, %cst [1, 2] : vector<1x1x8xf32> to vector<1xf32>
    %9 = vector.shape_cast %8 : vector<1xf32> to vector<1x1x1xf32>
    %10 = vector.extract %9[0, 0, 0] : f32 from vector<1x1x1xf32>
    %11 = vector.shape_cast %4 : vector<8x128xf32> to vector<1x8x128xf32>
    %cst_7 = arith.constant dense<0.000000e+00> : vector<1xf32>
    %12 = vector.multi_reduction <add>, %11, %cst_7 [1, 2] : vector<1x8x128xf32> to vector<1xf32>
    %13 = vector.shape_cast %12 : vector<1xf32> to vector<1x1x1xf32>
    %14 = vector.extract %13[0, 0, 0] : f32 from vector<1x1x1xf32>
    %15 = arith.subf %10, %14 : f32
    %c0_8 = arith.constant 0 : index
    %c0_9 = arith.constant 0 : index
    %16 = memref.load %arg4[%c0_8, %c0_9] : memref<1x1xf32, #tpu.memory_space<smem>>
    memref.store %15, %arg4[%c0_8, %c0_9] : memref<1x1xf32, #tpu.memory_space<smem>>
    return
  }
}

</mosaic_0001>

<bundles_post_ra>
// kernel: tpu_custom_call.1
= control target key start
LH: loop header
LB: loop body
LE: loop exit
PB: predicated region body
PF: predicated region fallthrough
CT: control target
= control target key end

     0   :  { %9 = vsyncpa [#allocation3], 0  ;;  %s209_s0 = inlined_call_operand.hbm [shape: f32[8,128], index: 0, kind: input, shape index: {}]   ;;  %s210_s1 = inlined_call_operand.hbm [shape: f32[8,128], index: 1, kind: input, shape index: {}]   ;;  %s211_s2 = inlined_call_operand.vmem [shape: f32[1,8], index: 2, kind: input, shape index: {}]   ;;  %s212_s3 = inlined_call_operand.vmem [shape: f32[1,8], index: 3, kind: input, shape index: {}]   ;;  %s213_s4 = inlined_call_operand.hbm [shape: f32[1,1], index: 4, kind: output, shape index: {}]  }
   0x1   :  { %10 = vsyncpa [#allocation6], 0 }
   0x2   :  { %11 = vsyncpa [#allocation4], 0  ;;  %s17_s17 = sshll.u32 %s209_s0, 4  ;;  %s166_s18 = smov [#allocation2]   ;;  %s18_s17 = int_to_ptr.hbm [resolvable:$true] %s17_s17 }
   0x3   :  { %s19_s19 = sshll.u32 %s166_s18, 4  ;;  %s28_s22 = sshll.u32 %s210_s1, 4  ;;  %s20_s19 = int_to_ptr.vmem [resolvable:$true] %s19_s19  ;;  %s29_s22 = int_to_ptr.hbm [resolvable:$true] %s28_s22 }
   0x4   :  { %22 = dma.hbm_to_vmem [thread:$0]  %s18_s17, 128, %s20_s19, [#allocation3]  }
   0x5   :  { %s167_s23 = smov [#allocation5]  }
   0x6   :  { %s30_s24 = sshll.u32 %s167_s23, 4  ;;  %s31_s24 = int_to_ptr.vmem [resolvable:$true] %s30_s24 }
   0x7   :  { %33 = dma.hbm_to_vmem [thread:$0]  %s29_s22, 128, %s31_s24, [#allocation6]  }
   0x8   :  { %160 = dma.done.wait [#allocation3], 128  }
   0x9   :  { %161 = vsyncadd [#allocation3], 4294967168 }
   0xa   :  { %162 = dma.done.wait [#allocation6], 128  }
   0xb   :  { %163 = vsyncadd [#allocation6], 4294967168  ;;  %v48_v0 = vld [vmem:[%s211_s2] sm:$0x1]  ;;  %vm53_vm0 = vcmask 57344   ;;  %v47_v6 = vld [vmem:[#allocation5] sm:$0xff] }
   0xc   :  { %v49_v1 = vld [vmem:[%s212_s3] sm:$0x1]  ;;  %s81_s3 = sshll.u32 %s213_s4, 4  ;;  %s168_s5 = smov [#allocation7]   ;;  %s82_s3 = int_to_ptr.hbm [resolvable:$true] %s81_s3 }
   0xd   :  { %v51_v2 = vsub.f32 %v48_v0, %v49_v1  ;;  %v46_v5 = vld [vmem:[#allocation2] sm:$0xff] }
   0xe   :  { %v50_v7 = vmul.f32 %v47_v6, %v46_v5 }
   0xf   :  { %v52_v3 = vmul.f32 %v51_v2, %v51_v2 }
  0x11   :  { %v54_v4 = vsel %vm53_vm0, %v52_v3, 0.0 }
  0x12   :  { %55 = vadd.xlane.f32.xlu0 %v54_v4 }
  0x1a   :  { %64 = vadd.xlane.f32.xlu0 %v50_v7 }
  0x85   :  { %v56_v8 = vpop.xlane.xlu0 %55 }
  0x86   :  { %v57_v9 = vrot.slane %v56_v8, 4 }
  0x88   :  { %v58_v10 = vadd.f32 %v57_v9, %v56_v8 }
  0x8a   :  { %v59_v11 = vrot.slane %v58_v10, 2 }
  0x8c   :  { %v60_v12 = vadd.f32 %v59_v11, %v58_v10 }
  0x8d   :  { %v65_v13 = vpop.xlane.xlu0 %64 }
  0x8e   :  { %v66_v14 = vrot.slane %v65_v13, 4  ;;  %v61_v15 = vrot.slane %v60_v12, 1 }
  0x90   :  { %v67_v16 = vadd.f32 %v66_v14, %v65_v13  ;;  %v62_v17 = vadd.f32 %v61_v15, %v60_v12 }
  0x92   :  { %v68_v18 = vrot.slane %v67_v16, 2  ;;  %93 = vpush %v62_v17 }
  0x94   :  { %v69_v19 = vadd.f32 %v68_v18, %v67_v16 }
  0x96   :  { %v70_v20 = vrot.slane %v69_v19, 1 }
  0x98   :  { %v71_v21 = vadd.f32 %v70_v20, %v69_v19 }
  0x9a   :  { %95 = vpush %v71_v21 }
  0xc3   :  { %s94_s28 = spop %93 }
  0xcb   :  { %s96_s29 = spop %95 }
  0xcc   :  { %s73_s30 = ssub.f32 %s94_s28, %s96_s29 }
  0xce   :  { %75 = sst [smem:[#allocation7]] %s73_s30 }
  0xcf   :  { %84 = dma.smem_to_hbm %s168_s5, 16, %s82_s3, [#allocation4]  }
  0xd0   :  { %164 = dma.done.wait [#allocation4], 16  }
  0xd1   :  { %165 = vsyncadd [#allocation4], 4294967280 }
  0xd2   :  { %89 = sfence }
  0xd3   :  { %90 = vsyncpa [#allocation3], 1 }
  0xd4   :  { %91 = vsyncpa [#allocation6], 1 }
  0xd5   :  { %92 = vsyncpa [#allocation4], 1 }

</bundles_post_ra>
